<compile_context>
chip_gen: v7x
topology: tpu7x:2x2x1
jax: 0.10.0
libtpu: 0.0.40
codegen_flags: <defaults>
</compile_context>

<pallas_src>
import functools

import jax
import jax.numpy as jnp
from jax.experimental import pallas as pl
from jax.experimental.pallas import tpu as pltpu

EPS = 1e-5  # PyTorch GroupNorm default eps


def stage_kernel(x_ref, w_ref, prm_ref, o_ref, s1_ref, s2_ref, *, p_real):
    # x_ref  : (1, K, TP)      patch tile (P on lanes) for sample n
    # w_ref  : (Cout, K)       flattened conv weight
    # prm_ref: (Cout, 3)       columns = [bias | gamma | beta]   (f32)
    # o_ref  : (1, Cout, Ppad) full-sample output block, resident across the P axis
    # s1/s2  : (Cout, 1)       running raw sum / sum-of-squares (VMEM scratch)
    p_idx = pl.program_id(1)
    n_pt = pl.num_programs(1)
    tp = x_ref.shape[2]
    cout = o_ref.shape[1]

    @pl.when(p_idx == 0)
    def _init():
        s1_ref[...] = jnp.zeros_like(s1_ref)
        s2_ref[...] = jnp.zeros_like(s2_ref)

    # Conv-as-matmul on the MXU (no bias in the hot loop): (Cout,K)@(K,TP)->(Cout,TP)
    y = jnp.dot(w_ref[...], x_ref[0], preferred_element_type=jnp.float32)

    # GroupNorm raw statistics in the same pass (padded lanes are zero -> no-op).
    s1_ref[...] += jnp.sum(y, axis=1, keepdims=True)
    s2_ref[...] += jnp.sum(y * y, axis=1, keepdims=True)

    # Stash un-normalized raw tile into the resident output block (lane-dense,
    # 128-aligned dynamic offset, unmasked stores).
    off = pl.multiple_of(p_idx * tp, tp)
    o_ref[0, :, pl.ds(off, tp)] = y

    # Last P tile of this sample: bias-correct the stats and finish GroupNorm as
    # one fused affine y_raw*a + c.
    @pl.when(p_idx == n_pt - 1)
    def _finalize():
        count = float(cout * p_real)
        b = prm_ref[:, 0:1]   # bias   (Cout, 1)
        g = prm_ref[:, 1:2]   # gamma  (Cout, 1)
        bt = prm_ref[:, 2:3]  # beta   (Cout, 1)
        s1r = s1_ref[...]
        s2r = s2_ref[...]
        # Stats of y = y_raw + b from raw sums (only the p_real real columns count).
        s1 = jnp.sum(s1r + p_real * b, keepdims=True)                        # (1, 1)
        s2 = jnp.sum(s2r + 2.0 * b * s1r + p_real * (b * b), keepdims=True)  # (1, 1)
        mean = s1 / count
        var = jnp.maximum(s2 / count - mean * mean, 0.0)  # biased var (PyTorch)
        inv = jax.lax.rsqrt(var + EPS)                    # EUP rsqrt
        a = inv * g                                       # rstd * gamma           (Cout, 1)
        c = bt + (b - mean) * a                           # beta + (bias-mean)*a   (Cout, 1)
        o_ref[0] = o_ref[0] * a + c


def _pick_tile_p(p_pad, k, in_bytes, budget_bytes=16 << 20):
    # Largest lane-dense tile dividing P_pad whose double-buffered input window
    # (2 * K * tp * bytes) fits the budget; the whole sample (tp == P_pad) is
    # preferred to minimize grid-step overhead (~0.35 us/step).
    for tp in (p_pad, 4096, 2048, 1024, 512, 256, 128):
        if tp <= p_pad and p_pad % tp == 0 and 2 * k * tp * in_bytes <= budget_bytes:
            return tp
    return 128


def stage_forward(x, conv_w, conv_b, gamma, beta, *, conv_r,
                  compute_dtype=jnp.float32, tile_p=None):
    """x: (N, Cin, D, H, W) f32; conv_w: (Cout, Cin, r, r, r); conv_b/gamma/beta: (Cout,)."""
    N, Cin, D, H, W = x.shape
    Cout = conv_w.shape[0]
    r = conv_r
    assert D % r == 0 and H % r == 0 and W % r == 0
    Dp, Hp, Wp = D // r, H // r, W // r
    P = Dp * Hp * Wp
    K = Cin * r * r * r
    P_pad = ((P + 127) // 128) * 128  # lane-dense (unmasked) stores

    in_bytes = jnp.dtype(compute_dtype).itemsize
    tp = _pick_tile_p(P_pad, K, in_bytes) if tile_p is None else tile_p
    assert P_pad % tp == 0
    n_pt = P_pad // tp

    # Patchify with P as the minor (lane) dim: (N, K, P), K ordered (cin, kd, kh, kw).
    xt = x.reshape(N, Cin, Dp, r, Hp, r, Wp, r)
    xt = xt.transpose(0, 1, 3, 5, 7, 2, 4, 6).reshape(N, K, P)
    if P_pad != P:
        xt = jnp.pad(xt, ((0, 0), (0, 0), (0, P_pad - P)))
    xt = xt.astype(compute_dtype)
    wk = conv_w.reshape(Cout, K).astype(compute_dtype)
    prm = jnp.stack([conv_b, gamma, beta], axis=1).astype(jnp.float32)  # (Cout, 3)

    # Resident output block: single-buffer it when large (v7x has only 64 MiB VMEM).
    out_block_bytes = Cout * P_pad * 4
    if out_block_bytes > (12 << 20):
        out_buffers = 1
        out_spec = pl.BlockSpec((1, Cout, P_pad), lambda n, p: (n, 0, 0),
                                pipeline_mode=pl.Buffered(1))
    else:
        out_buffers = 2
        out_spec = pl.BlockSpec((1, Cout, P_pad), lambda n, p: (n, 0, 0))

    # Explicit VMEM budget from the actual blocks (+ slack for compiler scratch).
    vmem_need = (2 * K * tp * in_bytes            # double-buffered patch tiles
                 + 2 * Cout * K * in_bytes        # weight
                 + 2 * Cout * 3 * 4               # bias/gamma/beta
                 + out_buffers * out_block_bytes  # resident output
                 + 2 * Cout * 4)                  # stats scratch
    vmem_limit = int(min(max(vmem_need + (4 << 20), 32 << 20), 100 << 20))

    kernel = functools.partial(stage_kernel, p_real=P)

    out = pl.pallas_call(
        kernel,
        out_shape=jax.ShapeDtypeStruct((N, Cout, P_pad), jnp.float32),
        grid_spec=pltpu.PrefetchScalarGridSpec(
            num_scalar_prefetch=0,
            grid=(N, n_pt),
            in_specs=[
                pl.BlockSpec((1, K, tp), lambda n, p: (n, 0, p)),
                pl.BlockSpec((Cout, K), lambda n, p: (0, 0)),
                pl.BlockSpec((Cout, 3), lambda n, p: (0, 0)),
            ],
            # Output block covers the whole sample; its index ignores the P axis,
            # so it stays resident in VMEM while P tiles accumulate into it.
            out_specs=out_spec,
            scratch_shapes=[
                pltpu.VMEM((Cout, 1), jnp.float32),
                pltpu.VMEM((Cout, 1), jnp.float32),
            ],
        ),
        compiler_params=pltpu.CompilerParams(
            dimension_semantics=("parallel", "arbitrary"),
            allow_input_fusion=[True, False, False],
            vmem_limit_bytes=vmem_limit,
        ),
    )(xt, wk, prm)

    if P_pad != P:
        out = out[:, :, :P]
    # (N, Cout, P) is already NCDHW' up to a free reshape — no transpose needed.
    return out.reshape(N, Cout, Dp, Hp, Wp)


def reference_forward(x, conv_w, conv_b, gamma, beta, conv_r):
    """Pure-JAX reference (same math as Conv3d(stride=kernel) + GroupNorm(1))."""
    N, Cin, D, H, W = x.shape
    Cout = conv_w.shape[0]
    r = conv_r
    Dp, Hp, Wp = D // r, H // r, W // r
    P = Dp * Hp * Wp
    K = Cin * r * r * r
    xp = x.reshape(N, Cin, Dp, r, Hp, r, Wp, r)
    xp = xp.transpose(0, 2, 4, 6, 1, 3, 5, 7).reshape(N, P, K)
    y = jnp.einsum("npk,ck->npc", xp, conv_w.reshape(Cout, K)) + conv_b[None, None, :]
    mean = jnp.mean(y, axis=(1, 2), keepdims=True)
    var = jnp.mean((y - mean) ** 2, axis=(1, 2), keepdims=True)
    y = (y - mean) * jax.lax.rsqrt(var + EPS) * gamma[None, None, :] + beta[None, None, :]
    return y.reshape(N, Dp, Hp, Wp, Cout).transpose(0, 4, 1, 2, 3)


if __name__ == "__main__":
    # Stage(dim_in=4, dim_out=32, conv_r=2) at spatial 16 -> P = 8*8*8 = 512, K = 32.
    N, Cin, D, H, W = 2, 4, 16, 16, 16
    Cout, conv_r = 32, 2

    key = jax.random.PRNGKey(0)
    kx, kw, kb, kg, ke = jax.random.split(key, 5)

    x = jax.random.normal(kx, (N, Cin, D, H, W), dtype=jnp.float32)
    fan_in = Cin * conv_r ** 3
    conv_w = jax.random.normal(kw, (Cout, Cin, conv_r, conv_r, conv_r),
                               dtype=jnp.float32) * (1.0 / fan_in) ** 0.5
    conv_b = jax.random.normal(kb, (Cout,), dtype=jnp.float32) * 0.01
    gamma = 1.0 + 0.1 * jax.random.normal(kg, (Cout,), dtype=jnp.float32)
    beta = 0.05 * jax.random.normal(ke, (Cout,), dtype=jnp.float32)

    fwd = jax.jit(stage_forward, static_argnames=("conv_r", "compute_dtype", "tile_p"))
    ref = reference_forward(x, conv_w, conv_b, gamma, beta, conv_r)

    # f32 path (faithful to the PyTorch module's precision).
    out_f32 = jax.block_until_ready(fwd(x, conv_w, conv_b, gamma, beta, conv_r=conv_r))
    assert out_f32.shape == (N, Cout, D // conv_r, H // conv_r, W // conv_r)
    err_f32 = float(jnp.max(jnp.abs(out_f32 - ref)))
    assert err_f32 < 3e-4, f"f32 max abs err {err_f32}"

    # bf16-input path (halves dominant HBM traffic; MXU accumulates in f32,
    # GroupNorm renormalizes so the error stays small).
    out_bf16 = jax.block_until_ready(
        fwd(x, conv_w, conv_b, gamma, beta, conv_r=conv_r, compute_dtype=jnp.bfloat16))
    err_bf16 = float(jnp.max(jnp.abs(out_bf16 - ref)))
    assert err_bf16 < 1e-1, f"bf16 max abs err {err_bf16}"

    print("KERNEL_OK")
</pallas_src>

<mosaic_0001>
module attributes {stable_mosaic.version = 11 : i64} {
  func.func @stage_kernel(%arg0: i32, %arg1: i32, %arg2: memref<1x32x512xf32, #tpu.memory_space<vmem>>, %arg3: memref<32x32xf32, #tpu.memory_space<vmem>>, %arg4: memref<32x3xf32, #tpu.memory_space<vmem>>, %arg5: memref<1x32x512xf32, #tpu.memory_space<vmem>>, %arg6: memref<32x1xf32, #tpu.memory_space<vmem>>, %arg7: memref<32x1xf32, #tpu.memory_space<vmem>>) attributes {dimension_semantics = [#tpu.dimension_semantics<parallel>, #tpu.dimension_semantics<arbitrary>], iteration_bounds = array<i64: 2, 1>, scalar_prefetch = 0 : i64, scratch_operands = 2 : i64, tpu.core_type = #tpu.core_type<tc>, window_params = [{transform_indices = @transform_0, window_bounds = array<i64: 1, 32, 512>}, {pipeline_mode = #tpu.pipeline_mode<synchronous>, transform_indices = @transform_1, window_bounds = array<i64: 32, 32>}, {pipeline_mode = #tpu.pipeline_mode<synchronous>, transform_indices = @transform_2, window_bounds = array<i64: 32, 3>}, {transform_indices = @transform_3, window_bounds = array<i64: 1, 32, 512>}]} {
    %c0_i32 = arith.constant 0 : i32
    %0 = arith.cmpi eq, %arg1, %c0_i32 : i32
    %1 = arith.extui %0 : i1 to i32
    %c0_i32_0 = arith.constant 0 : i32
    %2 = arith.cmpi ne, %1, %c0_i32_0 : i32
    scf.if %2 {
      %cst_19 = arith.constant 0.000000e+00 : f32
      %27 = vector.broadcast %cst_19 : f32 to vector<32x1xf32>
      %c0_20 = arith.constant 0 : index
      %c0_21 = arith.constant 0 : index
      %28 = vector.load %arg6[%c0_20, %c0_21] : memref<32x1xf32, #tpu.memory_space<vmem>>, vector<32x1xf32>
      tpu.vector_store %arg6[%c0_20, %c0_21], %27 {strides = array<i32>} : memref<32x1xf32, #tpu.memory_space<vmem>>, vector<32x1xf32>,
      %cst_22 = arith.constant 0.000000e+00 : f32
      %29 = vector.broadcast %cst_22 : f32 to vector<32x1xf32>
      %c0_23 = arith.constant 0 : index
      %c0_24 = arith.constant 0 : index
      %30 = vector.load %arg7[%c0_23, %c0_24] : memref<32x1xf32, #tpu.memory_space<vmem>>, vector<32x1xf32>
      tpu.vector_store %arg7[%c0_23, %c0_24], %29 {strides = array<i32>} : memref<32x1xf32, #tpu.memory_space<vmem>>, vector<32x1xf32>,
    } else {
    }
    %c0 = arith.constant 0 : index
    %c0_1 = arith.constant 0 : index
    %3 = vector.load %arg3[%c0, %c0_1] : memref<32x32xf32, #tpu.memory_space<vmem>>, vector<32x32xf32>
    %c0_2 = arith.constant 0 : index
    %c0_3 = arith.constant 0 : index
    %c0_4 = arith.constant 0 : index
    %4 = vector.load %arg2[%c0_2, %c0_3, %c0_4] : memref<1x32x512xf32, #tpu.memory_space<vmem>>, vector<1x32x512xf32>
    %5 = vector.shape_cast %4 : vector<1x32x512xf32> to vector<32x512xf32>
    %cst = arith.constant dense<0.000000e+00> : vector<32x512xf32>
    %6 = tpu.matmul %3, %5, %cst {dimension_numbers = #tpu.dot_dimension_numbers<[1], [0], [0], [1], [0, 0, 1, 1], [], []>} : vector<32x32xf32>, vector<32x512xf32>, vector<32x512xf32> -> vector<32x512xf32>
    %c0_5 = arith.constant 0 : index
    %c0_6 = arith.constant 0 : index
    %7 = vector.load %arg6[%c0_5, %c0_6] : memref<32x1xf32, #tpu.memory_space<vmem>>, vector<32x1xf32>
    %cst_7 = arith.constant dense<0.000000e+00> : vector<32xf32>
    %8 = vector.multi_reduction <add>, %6, %cst_7 [1] : vector<32x512xf32> to vector<32xf32>
    %9 = vector.shape_cast %8 : vector<32xf32> to vector<32x1xf32>
    %10 = arith.addf %7, %9 : vector<32x1xf32>
    %c0_8 = arith.constant 0 : index
    %c0_9 = arith.constant 0 : index
    %11 = vector.load %arg6[%c0_8, %c0_9] : memref<32x1xf32, #tpu.memory_space<vmem>>, vector<32x1xf32>
    tpu.vector_store %arg6[%c0_8, %c0_9], %10 {strides = array<i32>} : memref<32x1xf32, #tpu.memory_space<vmem>>, vector<32x1xf32>,
    %c0_10 = arith.constant 0 : index
    %c0_11 = arith.constant 0 : index
    %12 = vector.load %arg7[%c0_10, %c0_11] : memref<32x1xf32, #tpu.memory_space<vmem>>, vector<32x1xf32>
    %13 = arith.mulf %6, %6 : vector<32x512xf32>
    %cst_12 = arith.constant dense<0.000000e+00> : vector<32xf32>
    %14 = vector.multi_reduction <add>, %13, %cst_12 [1] : vector<32x512xf32> to vector<32xf32>
    %15 = vector.shape_cast %14 : vector<32xf32> to vector<32x1xf32>
    %16 = arith.addf %12, %15 : vector<32x1xf32>
    %c0_13 = arith.constant 0 : index
    %c0_14 = arith.constant 0 : index
    %17 = vector.load %arg7[%c0_13, %c0_14] : memref<32x1xf32, #tpu.memory_space<vmem>>, vector<32x1xf32>
    tpu.vector_store %arg7[%c0_13, %c0_14], %16 {strides = array<i32>} : memref<32x1xf32, #tpu.memory_space<vmem>>, vector<32x1xf32>,
    %c512_i32 = arith.constant 512 : i32
    %18 = arith.muli %arg1, %c512_i32 : i32
    %19 = tpu.assume_multiple %18, 512 : i32
    %c0_15 = arith.constant 0 : index
    %c0_16 = arith.constant 0 : index
    %20 = arith.index_cast %19 : i32 to index
    %21 = vector.load %arg5[%c0_15, %c0_16, %20] : memref<1x32x512xf32, #tpu.memory_space<vmem>>, vector<1x32x512xf32>
    %22 = vector.shape_cast %21 : vector<1x32x512xf32> to vector<32x512xf32>
    %23 = vector.shape_cast %6 : vector<32x512xf32> to vector<1x32x512xf32>
    tpu.vector_store %arg5[%c0_15, %c0_16, %20], %23 {strides = array<i32>} : memref<1x32x512xf32, #tpu.memory_space<vmem>>, vector<1x32x512xf32>,
    %c0_i32_17 = arith.constant 0 : i32
    %24 = arith.cmpi eq, %arg1, %c0_i32_17 : i32
    %25 = arith.extui %24 : i1 to i32
    %c0_i32_18 = arith.constant 0 : i32
    %26 = arith.cmpi ne, %25, %c0_i32_18 : i32
    scf.if %26 {
      %c0_19 = arith.constant 0 : index
      %c0_20 = arith.constant 0 : index
      %27 = vector.load %arg4[%c0_19, %c0_20] : memref<32x3xf32, #tpu.memory_space<vmem>>, vector<32x1xf32>
      %c0_21 = arith.constant 0 : index
      %c1 = arith.constant 1 : index
      %28 = vector.load %arg4[%c0_21, %c1] : memref<32x3xf32, #tpu.memory_space<vmem>>, vector<32x1xf32>
      %c0_22 = arith.constant 0 : index
      %c2 = arith.constant 2 : index
      %29 = vector.load %arg4[%c0_22, %c2] : memref<32x3xf32, #tpu.memory_space<vmem>>, vector<32x1xf32>
      %c0_23 = arith.constant 0 : index
      %c0_24 = arith.constant 0 : index
      %30 = vector.load %arg6[%c0_23, %c0_24] : memref<32x1xf32, #tpu.memory_space<vmem>>, vector<32x1xf32>
      %c0_25 = arith.constant 0 : index
      %c0_26 = arith.constant 0 : index
      %31 = vector.load %arg7[%c0_25, %c0_26] : memref<32x1xf32, #tpu.memory_space<vmem>>, vector<32x1xf32>
      %cst_27 = arith.constant 5.120000e+02 : f32
      %32 = vector.broadcast %cst_27 : f32 to vector<32x1xf32>
      %33 = arith.mulf %32, %27 : vector<32x1xf32>
      %34 = arith.addf %30, %33 : vector<32x1xf32>
      %35 = vector.shape_cast %34 : vector<32x1xf32> to vector<1x32x1xf32>
      %cst_28 = arith.constant dense<0.000000e+00> : vector<1xf32>
      %36 = vector.multi_reduction <add>, %35, %cst_28 [1, 2] : vector<1x32x1xf32> to vector<1xf32>
      %37 = vector.shape_cast %36 : vector<1xf32> to vector<1x1x1xf32>
      %38 = vector.extract %37[0, 0, 0] : f32 from vector<1x1x1xf32>
      %39 = vector.broadcast %38 : f32 to vector<1x1xf32>
      %cst_29 = arith.constant 2.000000e+00 : f32
      %40 = vector.broadcast %cst_29 : f32 to vector<32x1xf32>
      %41 = arith.mulf %40, %27 : vector<32x1xf32>
      %42 = arith.mulf %41, %30 : vector<32x1xf32>
      %43 = arith.addf %31, %42 : vector<32x1xf32>
      %44 = arith.mulf %27, %27 : vector<32x1xf32>
      %cst_30 = arith.constant 5.120000e+02 : f32
      %45 = vector.broadcast %cst_30 : f32 to vector<32x1xf32>
      %46 = arith.mulf %45, %44 : vector<32x1xf32>
      %47 = arith.addf %43, %46 : vector<32x1xf32>
      %48 = vector.shape_cast %47 : vector<32x1xf32> to vector<1x32x1xf32>
      %cst_31 = arith.constant dense<0.000000e+00> : vector<1xf32>
      %49 = vector.multi_reduction <add>, %48, %cst_31 [1, 2] : vector<1x32x1xf32> to vector<1xf32>
      %50 = vector.shape_cast %49 : vector<1xf32> to vector<1x1x1xf32>
      %51 = vector.extract %50[0, 0, 0] : f32 from vector<1x1x1xf32>
      %52 = vector.broadcast %51 : f32 to vector<1x1xf32>
      %cst_32 = arith.constant 1.638400e+04 : f32
      %53 = vector.broadcast %cst_32 : f32 to vector<1x1xf32>
      %54 = arith.divf %39, %53 : vector<1x1xf32>
      %cst_33 = arith.constant 1.638400e+04 : f32
      %55 = vector.broadcast %cst_33 : f32 to vector<1x1xf32>
      %56 = arith.divf %52, %55 : vector<1x1xf32>
      %57 = arith.mulf %54, %54 : vector<1x1xf32>
      %58 = arith.subf %56, %57 : vector<1x1xf32>
      %cst_34 = arith.constant 0.000000e+00 : f32
      %59 = vector.broadcast %cst_34 : f32 to vector<1x1xf32>
      %60 = arith.maximumf %58, %59 : vector<1x1xf32>
      %cst_35 = arith.constant 9.99999974E-6 : f32
      %61 = vector.broadcast %cst_35 : f32 to vector<1x1xf32>
      %62 = arith.addf %60, %61 : vector<1x1xf32>
      %63 = math.rsqrt %62 : vector<1x1xf32>
      %64 = vector.broadcast %63 : vector<1x1xf32> to vector<32x1xf32>
      %65 = arith.mulf %64, %28 : vector<32x1xf32>
      %66 = vector.broadcast %54 : vector<1x1xf32> to vector<32x1xf32>
      %67 = arith.subf %27, %66 : vector<32x1xf32>
      %68 = arith.mulf %67, %65 : vector<32x1xf32>
      %69 = arith.addf %29, %68 : vector<32x1xf32>
      %c0_36 = arith.constant 0 : index
      %c0_37 = arith.constant 0 : index
      %c0_38 = arith.constant 0 : index
      %70 = vector.load %arg5[%c0_36, %c0_37, %c0_38] : memref<1x32x512xf32, #tpu.memory_space<vmem>>, vector<1x32x512xf32>
      %71 = vector.shape_cast %70 : vector<1x32x512xf32> to vector<32x512xf32>
      %72 = vector.broadcast %65 : vector<32x1xf32> to vector<32x512xf32>
      %73 = arith.mulf %71, %72 : vector<32x512xf32>
      %74 = vector.broadcast %69 : vector<32x1xf32> to vector<32x512xf32>
      %75 = arith.addf %73, %74 : vector<32x512xf32>
      %c0_39 = arith.constant 0 : index
      %c0_40 = arith.constant 0 : index
      %c0_41 = arith.constant 0 : index
      %76 = vector.load %arg5[%c0_39, %c0_40, %c0_41] : memref<1x32x512xf32, #tpu.memory_space<vmem>>, vector<1x32x512xf32>
      %77 = vector.shape_cast %76 : vector<1x32x512xf32> to vector<32x512xf32>
      %78 = vector.shape_cast %75 : vector<32x512xf32> to vector<1x32x512xf32>
      tpu.vector_store %arg5[%c0_39, %c0_40, %c0_41], %78 {strides = array<i32>} : memref<1x32x512xf32, #tpu.memory_space<vmem>>, vector<1x32x512xf32>,
    } else {
    }
    return
  }
  func.func @transform_0(%arg0: i32, %arg1: i32) -> (i32, i32, i32) {
    %c0_i32 = arith.constant 0 : i32
    %c0_i32_0 = arith.constant 0 : i32
    return %arg0, %c0_i32, %arg1 : i32, i32, i32
  }
  func.func @transform_1(%arg0: i32, %arg1: i32) -> (i32, i32) {
    %c0_i32 = arith.constant 0 : i32
    %c0_i32_0 = arith.constant 0 : i32
    %c0_i32_1 = arith.constant 0 : i32
    return %c0_i32, %c0_i32_0 : i32, i32
  }
  func.func @transform_2(%arg0: i32, %arg1: i32) -> (i32, i32) {
    %c0_i32 = arith.constant 0 : i32
    %c0_i32_0 = arith.constant 0 : i32
    %c0_i32_1 = arith.constant 0 : i32
    return %c0_i32, %c0_i32_0 : i32, i32
  }
  func.func @transform_3(%arg0: i32, %arg1: i32) -> (i32, i32, i32) {
    %c0_i32 = arith.constant 0 : i32
    %c0_i32_0 = arith.constant 0 : i32
    %c0_i32_1 = arith.constant 0 : i32
    return %arg0, %c0_i32, %c0_i32_0 : i32, i32, i32
  }
}

</mosaic_0001>

<bundles_post_ra>
// kernel: stage_forward.1
= control target key start
LH: loop header
LB: loop body
LE: loop exit
PB: predicated region body
PF: predicated region fallthrough
CT: control target
= control target key end

     0   :  { %s958_s12 = smov 0   ;;  %s960_s13 = smov 0   ;;  %s1220_s0 = inlined_call_operand.vmem [shape: f32[2,32,512], index: 0, kind: input, shape index: {}]   ;;  %s1221_s1 = inlined_call_operand.vmem [shape: f32[32,32], index: 1, kind: input, shape index: {}]   ;;  %s1222_s2 = inlined_call_operand.vmem [shape: f32[32,3], index: 2, kind: input, shape index: {}]   ;;  %s1223_s3 = inlined_call_operand.vmem [shape: f32[2,32,512], index: 3, kind: output, shape index: {}]  }
   0x1   :  { %s962_s14 = smov 0  }
   0x2 LB: > { %s25_s15 = sadd.s32 1, %s927_s13  ;;  %p837_p0 = scmp.ge.s32.totalorder %s931_s14, 1  ;;  %s931_s14 = sphi %s962_s14, %s13_s14   ;;  %s927_s13 = sphi %s960_s13, %s1225_s13   ;;  %s923_s12 = sphi %s958_s12, %s1224_s12  }
   0x3   : > { %p27_p1 = scmp.ge.s32.totalorder %s25_s15, 2  ;;  %p156_p2 = scmp.lt.s32.totalorder %s931_s14, 3 }
   0x5   : > { %s1227_s15 = smov (%p27_p1, %s25_s15), 0  ;;  %p157_p3 = pnand %p837_p0, %p156_p2 }
   0x6   : > { %p185_p4 = scmp.lt.s32.totalorder (!%p157_p3), %s923_s12, 1  ;;  %v933_v0 = vmov (!%p157_p3), 0.0   ;;  %v212_v25 = vld [vmem:[%s1221_s1] sm:$0xff] (!%p157_p3)  ;;  %vm232_vm0 = vcmask (!%p157_p3), 261120   ;;  %v213_v26 = vld [vmem:[%s1221_s1 + $0x8] sm:$0xff] (!%p157_p3)  ;;  %v214_v27 = vld [vmem:[%s1221_s1 + $0x10] sm:$0xff] (!%p157_p3) }
   0x7   : > { %160 = sbr.rel (%p157_p3) target bundleno = 1023 (0x3ff), region = 32  ;;  %309 = vmatprep.mubr.f32.mxu0 (!%p157_p3), %v933_v0  ;;  %398 = vmatprep.mubr.f32.mxu1 (!%p157_p3), %v933_v0  ;;  %v215_v28 = vld [vmem:[%s1221_s1 + $0x18] sm:$0xff] (!%p157_p3)  ;;  %vm203_vm1 = vcmask (!%p157_p3), 7168   ;;  %s935_s11 = smov (!%p157_p3), 127  }
   0x8   : > { %204 = vst.msk [vmem:[#allocation2] sm:$0xff] (!%p157_p3), %vm203_vm1, %v933_v0  ;;  %205 = vst.msk [vmem:[#allocation2 + $0x8] sm:$0xff] (!%p157_p3), %vm203_vm1, %v933_v0  ;;  %s936_s17 = smov (!%p157_p3), 2  }
   0x9   : > { %206 = vst.msk [vmem:[#allocation2 + $0x10] sm:$0xff] (!%p157_p3), %vm203_vm1, %v933_v0  ;;  %207 = vst.msk [vmem:[#allocation2 + $0x18] sm:$0xff] (!%p157_p3), %vm203_vm1, %v933_v0 }
   0xa   : > { %208 = vst.msk [vmem:[#allocation3] sm:$0xff] (!%p157_p3), %vm203_vm1, %v933_v0  ;;  %209 = vst.msk [vmem:[#allocation3 + $0x8] sm:$0xff] (!%p157_p3), %vm203_vm1, %v933_v0 }
   0xb   : > { %210 = vst.msk [vmem:[#allocation3 + $0x10] sm:$0xff] (!%p157_p3), %vm203_vm1, %v933_v0  ;;  %211 = vst.msk [vmem:[#allocation3 + $0x18] sm:$0xff] (!%p157_p3), %vm203_vm1, %v933_v0 }
   0xe   : > { %s1229_s12 = smov (!%p185_p4, %s923_s12), 1 }
   0xf   : > { %s852_s16 = sshll.u32 %s1229_s12, 7 }
  0x10   : > { %s192_s19 = scalar_lea.vmem %s1220_s0, %s852_s16  ;;  %s1181_s20 = scalar_lea.vmem %s1223_s3, %s852_s16 }
  0x11   : > { %v217_v1 = vld [vmem:[%s192_s19 + $0x8] sm:$0xff]  ;;  %v216_v3 = vld [vmem:[%s192_s19] sm:$0xff]  ;;  %v219_v6 = vld [vmem:[%s192_s19 + $0x18] sm:$0xff] }
  0x12   : > { %v221_v2 = vld [vmem:[%s192_s19 + $0x28] sm:$0xff]  ;;  %v220_v5 = vld [vmem:[%s192_s19 + $0x20] sm:$0xff]  ;;  %v223_v7 = vld [vmem:[%s192_s19 + $0x38] sm:$0xff] }
  0x13   : > { %v854_v4 = vpack.c.bf16 %v221_v2, %v217_v1  ;;  %v856_v8 = vpack.c.bf16 %v220_v5, %v216_v3  ;;  %v862_v9 = vpack.c.bf16 %v223_v7, %v219_v6  ;;  %v218_v10 = vld [vmem:[%s192_s19 + $0x10] sm:$0xff]  ;;  %v225_v12 = vld [vmem:[%s192_s19 + $0x48] sm:$0xff]  ;;  %v224_v15 = vld [vmem:[%s192_s19 + $0x40] sm:$0xff] }
  0x14   : > { %v222_v11 = vld [vmem:[%s192_s19 + $0x30] sm:$0xff]  ;;  %v229_v14 = vld [vmem:[%s192_s19 + $0x68] sm:$0xff]  ;;  %v228_v16 = vld [vmem:[%s192_s19 + $0x60] sm:$0xff] }
  0x15   : > { %855 = vmatprep.subr.bf16.mxu0 %v854_v4  ;;  %v864_v13 = vpack.c.bf16 %v222_v11, %v218_v10  ;;  %863 = vmatprep.subr.bf16.mxu1 %v862_v9  ;;  %v858_v17 = vpack.c.bf16 %v229_v14, %v225_v12  ;;  %v860_v18 = vpack.c.bf16 %v228_v16, %v224_v15  ;;  %v227_v19 = vld [vmem:[%s192_s19 + $0x58] sm:$0xff]  ;;  %v226_v21 = vld [vmem:[%s192_s19 + $0x50] sm:$0xff] }
  0x16   : > { %857 = vmatpush1.bf16.msra.mxu0 %v856_v8  ;;  %v231_v20 = vld [vmem:[%s192_s19 + $0x78] sm:$0xff]  ;;  %v230_v23 = vld [vmem:[%s192_s19 + $0x70] sm:$0xff] }
  0x17   : > { %865 = vmatpush1.bf16.msra.mxu1 %v864_v13  ;;  %v866_v22 = vpack.c.bf16 %v231_v20, %v227_v19  ;;  %859 = vmatprep.subr.bf16.mxu0 %v858_v17  ;;  %v868_v24 = vpack.c.bf16 %v230_v23, %v226_v21  ;;  %v423_v21 = vld [vmem:[#allocation2] sm:$0xff] }
  0x19   : > { %867 = vmatprep.subr.bf16.mxu1 %v866_v22 }
  0x1a   : > { %861 = vmatpush1.bf16.msra.mxu0 %v860_v18 }
  0x1b   : > { %869 = vmatpush1.bf16.msra.mxu1 %v868_v24  ;;  %v456_v24 = vld [vmem:[#allocation3] sm:$0xff] }
  0x1d   : > { %842 = vmatmul.mubr.msk.f32.vlgmr.msra.gmra.mrb[0].mxu0 %vm232_vm0, %v212_v25 }
  0x1e   : > { %846 = vmatmul.mubr.msk.f32.vlgmr.msra.gmra.mrb[0].mxu1 %vm232_vm0, %v212_v25  ;;  %315 = vmatprep.mubr.f32.mxu0 %v933_v0  ;;  %v424_v25 = vld [vmem:[#allocation2 + $0x8] sm:$0xff] }
  0x1f   : > { %404 = vmatprep.mubr.f32.mxu1 %v933_v0 }
  0x21   : > { %843 = vmatmul.mubr.msk.f32.gmra.mrb[2].mxu0 %vm232_vm0, %v213_v26 }
  0x22   : > { %847 = vmatmul.mubr.msk.f32.gmra.mrb[2].mxu1 %vm232_vm0, %v213_v26  ;;  %321 = vmatprep.mubr.f32.mxu0 %v933_v0 }
  0x23   : > { %410 = vmatprep.mubr.f32.mxu1 %v933_v0 }
  0x25   : > { %844 = vmatmul.mubr.msk.f32.gmra.mrb[4].mxu0 %vm232_vm0, %v214_v27 }
  0x26   : > { %848 = vmatmul.mubr.msk.f32.gmra.mrb[4].mxu1 %vm232_vm0, %v214_v27  ;;  %327 = vmatprep.mubr.f32.mxu0 %v933_v0 }
  0x27   : > { %416 = vmatprep.mubr.f32.mxu1 %v933_v0 }
  0x29   : > { %845 = vmatmul.mubr.msk.f32.gmra.mrb[6].mxu0 %vm232_vm0, %v215_v28 }
  0x2a   : > { %849 = vmatmul.mubr.msk.f32.gmra.mrb[6].mxu1 %vm232_vm0, %v215_v28 }
  0xf0   : > { %v1028_v29 = vpop.f32.mrb[0].mxu0 }
  0xf1   : > { %v460_v30 = vmul.f32 %v1028_v29, %v1028_v29  ;;  %v1032_v31 = vpop.f32.mrb[1].mxu0  ;;  %v1034_v32 = vpop.f32.mrb[0].mxu1 }
  0xf2   : > { %v427_v33 = vadd.f32 %v1032_v31, %v1028_v29  ;;  %v461_v34 = vmul.f32 %v1032_v31, %v1032_v31  ;;  %v1040_v35 = vpop.f32.mrb[1].mxu1  ;;  %v462_v36 = vmul.f32 %v1034_v32, %v1034_v32 }
  0xf3   : > { %v463_v48 = vmul.f32 %v1040_v35, %v1040_v35 }
  0xf4   : > { %v1044_v37 = vpop.f32.mrb[2].mxu0  ;;  %v428_v38 = vadd.f32 %v427_v33, %v1034_v32  ;;  %v476_v39 = vadd.f32 %v461_v34, %v460_v30  ;;  %v457_v33 = vld [vmem:[#allocation3 + $0x8] sm:$0xff]  ;;  %v425_v34 = vld [vmem:[#allocation2 + $0x10] sm:$0xff] }
  0xf5   : > { %v464_v40 = vmul.f32 %v1044_v37, %v1044_v37  ;;  %v1049_v41 = vpop.f32.mrb[3].mxu0  ;;  %v1051_v42 = vpop.f32.mrb[2].mxu1 }
  0xf6   : > { %v432_v43 = vadd.f32 %v1049_v41, %v1044_v37  ;;  %v465_v44 = vmul.f32 %v1049_v41, %v1049_v41  ;;  %v1057_v45 = vpop.f32.mrb[3].mxu1  ;;  %v429_v46 = vadd.f32 %v428_v38, %v1040_v35  ;;  %v466_v47 = vmul.f32 %v1051_v42, %v1051_v42 }
  0xf7   : > { %v477_v49 = vadd.f32 %v476_v39, %v462_v36  ;;  %v467_v62 = vmul.f32 %v1057_v45, %v1057_v45  ;;  %v1114_v39 = vld [vmem:[%s1222_s2] sm:$0xff] }
  0xf8   : > { %430 = vadd.xlane.f32.xlu0 %v429_v46  ;;  %v1064_v50 = vpop.f32.mrb[4].mxu0  ;;  %v433_v51 = vadd.f32 %v432_v43, %v1051_v42  ;;  %v481_v52 = vadd.f32 %v465_v44, %v464_v40  ;;  %v1119_v40 = vld [vmem:[%s1222_s2 + $0x8] sm:$0xff]  ;;  %v458_v46 = vld [vmem:[#allocation3 + $0x10] sm:$0xff] }
  0xf9   : > { %v468_v53 = vmul.f32 %v1064_v50, %v1064_v50  ;;  %v1069_v54 = vpop.f32.mrb[5].mxu0  ;;  %v1071_v55 = vpop.f32.mrb[4].mxu1  ;;  %v478_v56 = vadd.f32 %v477_v49, %v463_v48  ;;  %v541_v48 = vmul.f32 512.0, %v1119_v40  ;;  %v565_v49 = vmul.f32 2.0, %v1114_v39 }
  0xfa   : > { %v437_v57 = vadd.f32 %v1069_v54, %v1064_v50  ;;  %v469_v58 = vmul.f32 %v1069_v54, %v1069_v54  ;;  %v1077_v59 = vpop.f32.mrb[5].mxu1  ;;  %v434_v60 = vadd.f32 %v433_v51, %v1057_v45  ;;  %v470_v61 = vmul.f32 %v1071_v55, %v1071_v55 }
  0xfb   : > { %479 = vadd.xlane.f32.xlu1 %v478_v56  ;;  %v482_v63 = vadd.f32 %v481_v52, %v466_v47  ;;  %v471_v12 = vmul.f32 %v1077_v59, %v1077_v59  ;;  %v426_v47 = vld [vmem:[#allocation2 + $0x18] sm:$0xff] }
  0xfc   : > { %435 = vadd.xlane.f32.xlu0 %v434_v60  ;;  %v1084_v0 = vpop.f32.mrb[6].mxu0  ;;  %v438_v1 = vadd.f32 %v437_v57, %v1071_v55  ;;  %v486_v2 = vadd.f32 %v469_v58, %v468_v53  ;;  %v1128_v53 = vld [vmem:[%s1222_s2 + $0x10] sm:$0xff]  ;;  %v540_v57 = vmul.f32 512.0, %v1114_v39 }
  0xfd   : > { %v472_v3 = vmul.f32 %v1084_v0, %v1084_v0  ;;  %v1089_v4 = vpop.f32.mrb[7].mxu0  ;;  %v1091_v5 = vpop.f32.mrb[6].mxu1  ;;  %v483_v6 = vadd.f32 %v482_v63, %v467_v62  ;;  %v578_v62 = vmul.f32 %v1119_v40, %v1119_v40  ;;  %v459_v63 = vld [vmem:[#allocation3 + $0x18] sm:$0xff] }
  0xfe   : > { %v442_v7 = vadd.f32 %v1089_v4, %v1084_v0  ;;  %v473_v8 = vmul.f32 %v1089_v4, %v1089_v4  ;;  %v474_v9 = vmul.f32 %v1091_v5, %v1091_v5  ;;  %v1099_v10 = vpop.f32.mrb[7].mxu1  ;;  %v439_v11 = vadd.f32 %v438_v1, %v1077_v59 }
  0xff   : > { %v487_v13 = vadd.f32 %v486_v2, %v470_v61  ;;  %v475_v17 = vmul.f32 %v1099_v10, %v1099_v10  ;;  %v566_v61 = vmul.f32 2.0, %v1119_v40  ;;  %v577_v2 = vmul.f32 %v1114_v39, %v1114_v39 }
 0x100   : > { %v491_v14 = vadd.f32 %v473_v8, %v472_v3  ;;  %484 = vadd.xlane.f32.xlu0 %v483_v6  ;;  %440 = vadd.xlane.f32.xlu1 %v439_v11  ;;  %v443_v15 = vadd.f32 %v442_v7, %v1091_v5  ;;  %v1141_v3 = vld [vmem:[%s1222_s2 + $0x18] sm:$0xff]  ;;  %v542_v6 = vmul.f32 512.0, %v1128_v53  ;;  %v567_v11 = vmul.f32 2.0, %v1128_v53 }
 0x101   : > { %v488_v16 = vadd.f32 %v487_v13, %v471_v12  ;;  %v579_v13 = vmul.f32 %v1128_v53, %v1128_v53 }
 0x102   : > { %v444_v18 = vadd.f32 %v443_v15, %v1099_v10  ;;  %v492_v19 = vadd.f32 %v491_v14, %v474_v9 }
 0x104   : > { %489 = vadd.xlane.f32.xlu0 %v488_v16  ;;  %445 = vadd.xlane.f32.xlu1 %v444_v18  ;;  %v493_v20 = vadd.f32 %v492_v19, %v475_v17  ;;  %v582_v17 = vmul.f32 512.0, %v578_v62  ;;  %v543_v19 = vmul.f32 512.0, %v1141_v3 }
 0x108   : > { %494 = vadd.xlane.f32.xlu1 %v493_v20 }
 0x185   : > { %v431_v22 = vpop.xlane.xlu0 %430 }
 0x186   : > { %v447_v23 = vadd.f32 %v431_v22, %v423_v21  ;;  %v581_v21 = vmul.f32 512.0, %v577_v2 }
 0x188   : > { %452 = vst.msk [vmem:[#allocation2] sm:$0xff] %vm203_vm1, %v447_v23  ;;  %v480_v26 = vpop.xlane.xlu1 %479 }
 0x189   : > { %v496_v27 = vadd.f32 %v480_v26, %v456_v24  ;;  %v436_v28 = vpop.xlane.xlu0 %435  ;;  %v568_v26 = vmul.f32 2.0, %v1141_v3 }
 0x18a   : > { %v448_v30 = vadd.f32 %v436_v28, %v424_v25  ;;  %v583_v28 = vmul.f32 512.0, %v579_v13 }
 0x18b   : > { %500 = vst.msk [vmem:[#allocation3] sm:$0xff] %vm203_vm1, %v496_v27  ;;  %v580_v27 = vmul.f32 %v1141_v3, %v1141_v3 }
 0x18c   : > { %453 = vst.msk [vmem:[#allocation2 + $0x8] sm:$0xff] %vm203_vm1, %v448_v30 }
 0x18d   : > { %v485_v36 = vpop.xlane.xlu0 %484  ;;  %v441_v38 = vpop.xlane.xlu1 %440 }
 0x18e   : > { %v497_v43 = vadd.f32 %v485_v36, %v457_v33  ;;  %v449_v44 = vadd.f32 %v441_v38, %v425_v34 }
 0x18f   : > { %v532_v56 = vld [vmem:[#allocation2] sm:$0xff] }
 0x190   : > { %501 = vst.msk [vmem:[#allocation3 + $0x8] sm:$0xff] %vm203_vm1, %v497_v43  ;;  %454 = vst.msk [vmem:[#allocation2 + $0x10] sm:$0xff] %vm203_vm1, %v449_v44  ;;  %v569_v8 = vmul.f32 %v565_v49, %v532_v56  ;;  %v544_v15 = vadd.f32 %v540_v57, %v532_v56 }
 0x191   : > { %v490_v51 = vpop.xlane.xlu0 %489  ;;  %v446_v52 = vpop.xlane.xlu1 %445 }
 0x192   : > { %v498_v58 = vadd.f32 %v490_v51, %v458_v46  ;;  %v450_v60 = vadd.f32 %v446_v52, %v426_v47  ;;  %v536_v12 = vld [vmem:[#allocation3] sm:$0xff]  ;;  %v548_v30 = vsel %vm203_vm1, %v544_v15, 0.0  ;;  %v584_v51 = vmul.f32 512.0, %v580_v27 }
 0x193   : > { %v533_v1 = vld [vmem:[#allocation2 + $0x8] sm:$0xff]  ;;  %v573_v24 = vadd.f32 %v569_v8, %v536_v12 }
 0x194   : > { %502 = vst.msk [vmem:[#allocation3 + $0x10] sm:$0xff] %vm203_vm1, %v498_v58  ;;  %455 = vst.msk [vmem:[#allocation2 + $0x18] sm:$0xff] %vm203_vm1, %v450_v60  ;;  %v545_v7 = vadd.f32 %v541_v48, %v533_v1  ;;  %v570_v16 = vmul.f32 %v566_v61, %v533_v1 }
 0x195   : > { %v495_v9 = vpop.xlane.xlu1 %494  ;;  %v585_v48 = vadd.f32 %v581_v21, %v573_v24 }
 0x196   : > { %v499_v14 = vadd.f32 %v495_v9, %v459_v63  ;;  %v549_v23 = vsel %vm203_vm1, %v545_v7, 0.0 }
 0x197   : > { %v534_v18 = vld [vmem:[#allocation2 + $0x10] sm:$0xff]  ;;  %v537_v20 = vld [vmem:[#allocation3 + $0x8] sm:$0xff]  ;;  %v550_v43 = vadd.f32 %v549_v23, %v548_v30  ;;  %v589_v63 = vsel %vm203_vm1, %v585_v48, 0.0 }
 0x198   : > { %503 = vst.msk [vmem:[#allocation3 + $0x18] sm:$0xff] %vm203_vm1, %v499_v14  ;;  %v546_v22 = vadd.f32 %v542_v6, %v534_v18  ;;  %v574_v25 = vadd.f32 %v570_v16, %v537_v20  ;;  %v571_v34 = vmul.f32 %v567_v11, %v534_v18 }
 0x19a   : > { %v551_v33 = vsel %vm203_vm1, %v546_v22, 0.0  ;;  %v586_v36 = vadd.f32 %v582_v17, %v574_v25 }
 0x19b   : > { %v535_v38 = vld [vmem:[#allocation2 + $0x18] sm:$0xff]  ;;  %v538_v44 = vld [vmem:[#allocation3 + $0x10] sm:$0xff]  ;;  %v552_v49 = vadd.f32 %v551_v33, %v550_v43 }
 0x19c   : > { %v547_v46 = vadd.f32 %v543_v19, %v535_v38  ;;  %v575_v47 = vadd.f32 %v571_v34, %v538_v44  ;;  %v572_v56 = vmul.f32 %v568_v26, %v535_v38  ;;  %v590_v58 = vsel %vm203_vm1, %v586_v36, 0.0 }
 0x19d   : > { %v591_v2 = vadd.f32 %v590_v58, %v589_v63  ;;  %v934_v38 = vmov 1  }
 0x19e   : > { %v553_v52 = vsel %vm203_vm1, %v547_v46, 0.0  ;;  %v587_v57 = vadd.f32 %v583_v28, %v575_v47  ;;  %903 = vset.pattern.permute.xlu0 %v934_v38  ;;  %904 = vset.pattern.permute.xlu1 %v934_v38 }
 0x19f   : > { %v554_v60 = vadd.f32 %v553_v52, %v552_v49  ;;  %v539_v61 = vld [vmem:[#allocation3 + $0x18] sm:$0xff] }
 0x1a0   : > { %v576_v62 = vadd.f32 %v572_v56, %v539_v61  ;;  %v592_v1 = vsel %vm203_vm1, %v587_v57, 0.0 }
 0x1a1   : > { %555 = vadd.xlane.f32.xlu0 %v554_v60  ;;  %v593_v7 = vadd.f32 %v592_v1, %v591_v2 }
 0x1a2   : > { %v588_v6 = vadd.f32 %v584_v51, %v576_v62 }
 0x1a4   : > { %v594_v8 = vsel %vm203_vm1, %v588_v6, 0.0  ;;  %v937_v6 = vmov 2  }
 0x1a5   : > { %v595_v9 = vadd.f32 %v594_v8, %v593_v7 }
 0x1a7   : > { %596 = vadd.xlane.f32.xlu1 %v595_v9 }
 0x22e   : > { %v556_v11 = vpop.xlane.xlu0 %555 }
 0x22f   : > { %v557_v12 = vrot.slane %v556_v11, 4 }
 0x231   : > { %v558_v13 = vadd.f32 %v557_v12, %v556_v11 }
 0x233   : > { %v559_v14 = vrot.slane %v558_v13, 2 }
 0x234   : > { %v597_v15 = vpop.xlane.xlu1 %596 }
 0x235   : > { %v598_v16 = vrot.slane %v597_v15, 4  ;;  %v560_v17 = vadd.f32 %v559_v14, %v558_v13 }
 0x237   : > { %v599_v18 = vadd.f32 %v598_v16, %v597_v15  ;;  %v561_v19 = vrot.slane %v560_v17, 1 }
 0x239   : > { %v600_v20 = vrot.slane %v599_v18, 2  ;;  %v562_v21 = vadd.f32 %v561_v19, %v560_v17 }
 0x23b   : > { %870 = vpush %v562_v21  ;;  %v601_v22 = vadd.f32 %v600_v20, %v599_v18 }
 0x23d   : > { %v602_v23 = vrot.slane %v601_v22, 1 }
 0x23f   : > { %v603_v24 = vadd.f32 %v602_v23, %v601_v22 }
 0x241   : > { %872 = vpush %v603_v24 }
 0x26c   : > { %s871_s9 = spop %870 }
 0x26d   : > { %v564_v25 = vstv %s871_s9 }
 0x26e   : > { %v607_v26 = vmul.f32 6.1035156e-05, %v564_v25 }
 0x270   : > { %v609_v30 = vmul.f32 %v607_v26, %v607_v26  ;;  %v619_v49 = vsub.f32 %v1119_v40, %v607_v26  ;;  %v618_v51 = vsub.f32 %v1114_v39, %v607_v26  ;;  %v620_v60 = vsub.f32 %v1128_v53, %v607_v26 }
 0x271   : > { %v621_v63 = vsub.f32 %v1141_v3, %v607_v26 }
 0x272   : > { %s873_s10 = spop %872 }
 0x273   : > { %v605_v27 = vstv %s873_s10 }
 0x274   : > { %v608_v28 = vmul.f32 6.1035156e-05, %v605_v27 }
 0x276   : > { %v610_v33 = vsub.f32 %v608_v28, %v609_v30 }
 0x278   : > { %v611_v34 = vmax.f32 %v610_v33, 0.0 }
 0x27a   : > { %v612_v36 = vadd.f32 1e-05, %v611_v34 }
 0x27c   : > { %907 = vrsqrt.f32 %v612_v36 }
 0x286   : > { %v908_v43 = vpop.eup %907 }
 0x287   : > { %v615_v44 = vmul.f32 %v908_v43, %v1119_v40  ;;  %v614_v46 = vmul.f32 %v908_v43, %v1114_v39  ;;  %v616_v47 = vmul.f32 %v908_v43, %v1128_v53  ;;  %v617_v48 = vmul.f32 %v908_v43, %v1141_v3 }
 0x289   : > { %628 = vrot.lane.b32.xlu1 %v615_v44, %s935_s11  ;;  %626 = vrot.lane.b32.xlu0 %v614_v46, %s935_s11 }
 0x28d   : > { %630 = vrot.lane.b32.xlu1 %v616_v47, %s935_s11 }
 0x291   : > { %632 = vrot.lane.b32.xlu1 %v617_v48, %s935_s11 }
 0x2fb   : > { %v629_v52 = vpop.permute.xlu1 %628  ;;  %v627_v56 = vpop.permute.xlu0 %626 }
 0x2fc   : > { %v639_v57 = vmul.f32 %v629_v52, %v619_v49  ;;  %v638_v58 = vmul.f32 %v627_v56, %v618_v51 }
 0x2fe   : > { %648 = vrot.lane.b32.xlu1 %v639_v57, %s936_s17  ;;  %646 = vrot.lane.b32.xlu0 %v638_v58, %s936_s17 }
 0x2ff   : > { %v631_v61 = vpop.permute.xlu1 %630 }
 0x300   : > { %v640_v62 = vmul.f32 %v631_v61, %v620_v60 }
 0x302   : > { %650 = vrot.lane.b32.xlu0 %v640_v62, %s936_s17 }
 0x303   : > { %v633_v1 = vpop.permute.xlu1 %632 }
 0x304   : > { %v641_v2 = vmul.f32 %v633_v1, %v621_v63 }
 0x306   : > { %652 = vrot.lane.b32.xlu1 %v641_v2, %s936_s17  ;;  %679 = vperm.xlu0 %903, %v614_v46  }
 0x30a   : > { %683 = vperm.xlu1 %904, %v615_v44   ;;  %691 = vperm.xlu0 %903, %v617_v48  }
 0x30e   : > { %687 = vperm.xlu1 %904, %v616_v47   ;;  %906 = vset.pattern.permute.xlu0 %v937_v6 }
 0x312   : > { %905 = vset.pattern.permute.xlu1 %v937_v6 }
 0x370   : > { %v649_v7 = vpop.permute.xlu1 %648  ;;  %v647_v8 = vpop.permute.xlu0 %646 }
 0x371   : > { %v659_v9 = vadd.f32 %v649_v7, %v1119_v40  ;;  %v658_v11 = vadd.f32 %v647_v8, %v1114_v39 }
 0x373   : > { %717 = vperm.xlu0 %906, %v659_v9   ;;  %712 = vperm.xlu1 %905, %v658_v11  }
 0x374   : > { %v651_v12 = vpop.permute.xlu0 %650 }
 0x375   : > { %v660_v13 = vadd.f32 %v651_v12, %v1128_v53 }
 0x377   : > { %722 = vperm.xlu1 %905, %v660_v13  }
 0x378   : > { %v653_v14 = vpop.permute.xlu1 %652 }
 0x379   : > { %v661_v15 = vadd.f32 %v653_v14, %v1141_v3 }
 0x37b   : > { %727 = vperm.xlu1 %905, %v661_v15  }
 0x385   : > { %v680_v16 = vpop.permute.xlu0 %679 }
 0x386   : > { %v694_v20 = vmul.f32 %v680_v16, %v1028_v29  ;;  %v695_v40 = vmul.f32 %v680_v16, %v1032_v31  ;;  %v696_v39 = vmul.f32 %v680_v16, %v1034_v32  ;;  %v697_v21 = vmul.f32 %v680_v16, %v1040_v35 }
 0x389   : > { %v684_v17 = vpop.permute.xlu1 %683  ;;  %v692_v18 = vpop.permute.xlu0 %691 }
 0x38a   : > { %v698_v3 = vmul.f32 %v684_v17, %v1044_v37  ;;  %v699_v22 = vmul.f32 %v684_v17, %v1049_v41  ;;  %v700_v29 = vmul.f32 %v684_v17, %v1051_v42  ;;  %v701_v31 = vmul.f32 %v684_v17, %v1057_v45 }
 0x38b   : > { %v707_v36 = vmul.f32 %v692_v18, %v1089_v4  ;;  %v708_v38 = vmul.f32 %v692_v18, %v1091_v5  ;;  %v709_v43 = vmul.f32 %v692_v18, %v1099_v10 }
 0x38d   : > { %v688_v19 = vpop.permute.xlu1 %687 }
 0x38e   : > { %v702_v42 = vmul.f32 %v688_v19, %v1064_v50  ;;  %v703_v28 = vmul.f32 %v688_v19, %v1069_v54  ;;  %v704_v45 = vmul.f32 %v688_v19, %v1071_v55  ;;  %v705_v30 = vmul.f32 %v688_v19, %v1077_v59 }
 0x38f   : > { %v706_v59 = vmul.f32 %v692_v18, %v1084_v0 }
 0x3f2   : > { %v713_v53 = vpop.permute.xlu1 %712  ;;  %v718_v32 = vpop.permute.xlu0 %717 }
 0x3f3   : > { %v730_v35 = vadd.f32 %v713_v53, %v694_v20  ;;  %v731_v23 = vadd.f32 %v713_v53, %v695_v40  ;;  %v732_v24 = vadd.f32 %v713_v53, %v696_v39  ;;  %v733_v25 = vadd.f32 %v713_v53, %v697_v21 }
 0x3f4   : > { %v734_v37 = vadd.f32 %v718_v32, %v698_v3  ;;  %v735_v26 = vadd.f32 %v718_v32, %v699_v22  ;;  %v736_v41 = vadd.f32 %v718_v32, %v700_v29  ;;  %v737_v27 = vadd.f32 %v718_v32, %v701_v31 }
 0x3f5   : > { %746 = vst [vmem:[%s1181_s20] sm:$0xff] %v730_v35  ;;  %747 = vst [vmem:[%s1181_s20 + $0x8] sm:$0xff] %v731_v23 }
 0x3f6   : > { %748 = vst [vmem:[%s1181_s20 + $0x10] sm:$0xff] %v732_v24  ;;  %749 = vst [vmem:[%s1181_s20 + $0x18] sm:$0xff] %v733_v25  ;;  %v723_v33 = vpop.permute.xlu1 %722 }
 0x3f7   : > { %750 = vst [vmem:[%s1181_s20 + $0x20] sm:$0xff] %v734_v37  ;;  %751 = vst [vmem:[%s1181_s20 + $0x28] sm:$0xff] %v735_v26  ;;  %v738_v50 = vadd.f32 %v723_v33, %v702_v42  ;;  %v739_v34 = vadd.f32 %v723_v33, %v703_v28  ;;  %v740_v54 = vadd.f32 %v723_v33, %v704_v45 }
 0x3f8   : > { %752 = vst [vmem:[%s1181_s20 + $0x30] sm:$0xff] %v736_v41  ;;  %753 = vst [vmem:[%s1181_s20 + $0x38] sm:$0xff] %v737_v27  ;;  %v741_v55 = vadd.f32 %v723_v33, %v705_v30 }
 0x3f9   : > { %754 = vst [vmem:[%s1181_s20 + $0x40] sm:$0xff] %v738_v50  ;;  %755 = vst [vmem:[%s1181_s20 + $0x48] sm:$0xff] %v739_v34 }
 0x3fa   : > { %756 = vst [vmem:[%s1181_s20 + $0x50] sm:$0xff] %v740_v54  ;;  %757 = vst [vmem:[%s1181_s20 + $0x58] sm:$0xff] %v741_v55  ;;  %v728_v44 = vpop.permute.xlu1 %727 }
 0x3fb   : > { %v742_v46 = vadd.f32 %v728_v44, %v706_v59  ;;  %v743_v47 = vadd.f32 %v728_v44, %v707_v36  ;;  %v744_v48 = vadd.f32 %v728_v44, %v708_v38  ;;  %v745_v49 = vadd.f32 %v728_v44, %v709_v43 }
 0x3fd   : > { %758 = vst [vmem:[%s1181_s20 + $0x60] sm:$0xff] %v742_v46  ;;  %759 = vst [vmem:[%s1181_s20 + $0x68] sm:$0xff] %v743_v47 }
 0x3fe   : > { %760 = vst [vmem:[%s1181_s20 + $0x70] sm:$0xff] %v744_v48  ;;  %761 = vst [vmem:[%s1181_s20 + $0x78] sm:$0xff] %v745_v49 }
 0x3ff PF: > { %s13_s14 = sadd.s32 1, %s931_s14   ;;  %s1224_s12 = smov %s927_s13 }
 0x400   : > { %p10_p5 = scmp.ge.s32.totalorder %s13_s14, 4   ;;  %s1225_s13 = smov %s1227_s15 }
 0x402   :  { %12 = sbr.rel (!%p10_p5) target bundleno = 2 (0x2), region = 71 }

</bundles_post_ra>
